<compile_context>
chip_gen: v5e
topology: v5e:2x2
jax: 0.10.0
libtpu: 0.0.40
codegen_flags: <defaults>
</compile_context>

<pallas_src>
import jax
import jax.numpy as jnp
from jax import lax
from jax.experimental import pallas as pl
from jax.experimental.pallas import tpu as pltpu  # noqa: F401

T = 8             # signal length, matches `logits.view(8)` in the PyTorch module
_OUT_LANES = 128  # lane-dense output width


def pearson_loss_kernel(x_ref, y_ref, o_ref):
    # x_ref, y_ref: (B, T) f32 VMEM tiles (already cast in the wrapper);
    # o_ref: (B, 128) f32 VMEM tile, each row = that row's loss broadcast.
    x = x_ref[...]
    y = y_ref[...]
    n = float(x.shape[-1])
    inv_n = 1.0 / n

    # Single pass over the data: raw per-row sums only.  Mean-centering is
    # fused algebraically so no xm/ym vreg temporaries are materialized.
    sx = jnp.sum(x, axis=-1, keepdims=True)         # (B, 1)
    sy = jnp.sum(y, axis=-1, keepdims=True)
    sxy = jnp.sum(x * y, axis=-1, keepdims=True)
    sxx = jnp.sum(x * x, axis=-1, keepdims=True)
    syy = jnp.sum(y * y, axis=-1, keepdims=True)

    mx = sx * inv_n
    my = sy * inv_n
    ss_xy = sxy - n * mx * my                       # sum((x-mx)*(y-my))
    ss_xx = sxx - n * mx * mx                       # sum((x-mx)^2)
    ss_yy = syy - n * my * my                       # sum((y-my)^2)

    # One EUP rsqrt replaces two sqrts + a VPU divide.
    # NOTE: no epsilon clamp on the denominator, to match the PyTorch module
    # (a constant input produces NaN/Inf there as well).
    r = ss_xy * lax.rsqrt(ss_xx * ss_yy)            # Pearson correlation (B, 1)
    loss_plcc = 1.0 - r

    # Lane-dense write: unmasked vst across the full 128-lane row.
    o_ref[...] = jnp.broadcast_to(loss_plcc, o_ref.shape)


def pearson_loss(logits, target):
    """Negative Pearson correlation loss (returns loss_plcc, a scalar).

    Matches PearsonLoss.forward: view(8), center, dot, norms, 1 - r.
    NOTE: for production use this should either be computed in plain jnp or
    called with a batch of signals (B rows) per pallas_call — a single
    8-element Pearson is entirely launch-overhead bound on any TPU.
    """
    # Keep f32 in the wrapper (important on v5e: no bf16 VPU/EUP path).
    x = jnp.reshape(logits, (1, T)).astype(jnp.float32)
    y = jnp.reshape(target, (1, T)).astype(jnp.float32)
    b = x.shape[0]

    out = pl.pallas_call(
        pearson_loss_kernel,
        out_shape=jax.ShapeDtypeStruct((b, _OUT_LANES), jnp.float32),
        in_specs=[
            pl.BlockSpec((b, T), lambda: (0, 0)),
            pl.BlockSpec((b, T), lambda: (0, 0)),
        ],
        out_specs=pl.BlockSpec((b, _OUT_LANES), lambda: (0, 0)),
    )(x, y)
    # TODO(synk): spearman (scipy.stats.spearmanr / loss_srocc) has no Pallas
    # equivalent; it does not affect the returned value (loss_plcc), so it is
    # omitted.
    return out[0, 0]


if __name__ == "__main__":
    key = jax.random.PRNGKey(0)
    k1, k2 = jax.random.split(key)
    # Module docstring says (batch x signal_length); view(8) implies batch=1, T=8.
    logits = jax.random.normal(k1, (1, T), dtype=jnp.float32)
    target = jax.random.normal(k2, (1, T), dtype=jnp.float32)

    loss = pearson_loss(logits, target)
    jax.block_until_ready(loss)

    # Pure-JAX reference check (centered form, exact sqrt/divide).
    x = logits.reshape(T)
    y = target.reshape(T)
    xm = x - jnp.mean(x)
    ym = y - jnp.mean(y)
    ref = 1.0 - jnp.dot(xm, ym) / (jnp.linalg.norm(xm) * jnp.linalg.norm(ym))
    # Tolerance loosened slightly vs 1e-5: kernel uses fused centering + rsqrt.
    assert jnp.allclose(loss, ref, atol=1e-4, rtol=1e-4), (loss, ref)

    print("KERNEL_OK")
</pallas_src>

<mosaic_0001>
module attributes {stable_mosaic.version = 11 : i64} {
  func.func @pearson_loss_kernel(%arg0: memref<1x8xf32, #tpu.memory_space<vmem>>, %arg1: memref<1x8xf32, #tpu.memory_space<vmem>>, %arg2: memref<1x128xf32, #tpu.memory_space<vmem>>) attributes {dimension_semantics = [], scalar_prefetch = 0 : i64, scratch_operands = 0 : i64, tpu.core_type = #tpu.core_type<tc>} {
    %c0 = arith.constant 0 : index
    %c0_0 = arith.constant 0 : index
    %0 = vector.load %arg0[%c0, %c0_0] : memref<1x8xf32, #tpu.memory_space<vmem>>, vector<1x8xf32>
    %c0_1 = arith.constant 0 : index
    %c0_2 = arith.constant 0 : index
    %1 = vector.load %arg1[%c0_1, %c0_2] : memref<1x8xf32, #tpu.memory_space<vmem>>, vector<1x8xf32>
    %cst = arith.constant dense<0.000000e+00> : vector<1xf32>
    %2 = vector.multi_reduction <add>, %0, %cst [1] : vector<1x8xf32> to vector<1xf32>
    %3 = vector.shape_cast %2 : vector<1xf32> to vector<1x1xf32>
    %cst_3 = arith.constant dense<0.000000e+00> : vector<1xf32>
    %4 = vector.multi_reduction <add>, %1, %cst_3 [1] : vector<1x8xf32> to vector<1xf32>
    %5 = vector.shape_cast %4 : vector<1xf32> to vector<1x1xf32>
    %6 = arith.mulf %0, %1 : vector<1x8xf32>
    %cst_4 = arith.constant dense<0.000000e+00> : vector<1xf32>
    %7 = vector.multi_reduction <add>, %6, %cst_4 [1] : vector<1x8xf32> to vector<1xf32>
    %8 = vector.shape_cast %7 : vector<1xf32> to vector<1x1xf32>
    %9 = arith.mulf %0, %0 : vector<1x8xf32>
    %cst_5 = arith.constant dense<0.000000e+00> : vector<1xf32>
    %10 = vector.multi_reduction <add>, %9, %cst_5 [1] : vector<1x8xf32> to vector<1xf32>
    %11 = vector.shape_cast %10 : vector<1xf32> to vector<1x1xf32>
    %12 = arith.mulf %1, %1 : vector<1x8xf32>
    %cst_6 = arith.constant dense<0.000000e+00> : vector<1xf32>
    %13 = vector.multi_reduction <add>, %12, %cst_6 [1] : vector<1x8xf32> to vector<1xf32>
    %14 = vector.shape_cast %13 : vector<1xf32> to vector<1x1xf32>
    %cst_7 = arith.constant 1.250000e-01 : f32
    %15 = vector.broadcast %cst_7 : f32 to vector<1x1xf32>
    %16 = arith.mulf %3, %15 : vector<1x1xf32>
    %cst_8 = arith.constant 1.250000e-01 : f32
    %17 = vector.broadcast %cst_8 : f32 to vector<1x1xf32>
    %18 = arith.mulf %5, %17 : vector<1x1xf32>
    %cst_9 = arith.constant 8.000000e+00 : f32
    %19 = vector.broadcast %cst_9 : f32 to vector<1x1xf32>
    %20 = arith.mulf %19, %16 : vector<1x1xf32>
    %21 = arith.mulf %20, %18 : vector<1x1xf32>
    %22 = arith.subf %8, %21 : vector<1x1xf32>
    %cst_10 = arith.constant 8.000000e+00 : f32
    %23 = vector.broadcast %cst_10 : f32 to vector<1x1xf32>
    %24 = arith.mulf %23, %16 : vector<1x1xf32>
    %25 = arith.mulf %24, %16 : vector<1x1xf32>
    %26 = arith.subf %11, %25 : vector<1x1xf32>
    %cst_11 = arith.constant 8.000000e+00 : f32
    %27 = vector.broadcast %cst_11 : f32 to vector<1x1xf32>
    %28 = arith.mulf %27, %18 : vector<1x1xf32>
    %29 = arith.mulf %28, %18 : vector<1x1xf32>
    %30 = arith.subf %14, %29 : vector<1x1xf32>
    %31 = arith.mulf %26, %30 : vector<1x1xf32>
    %32 = math.rsqrt %31 : vector<1x1xf32>
    %33 = arith.mulf %22, %32 : vector<1x1xf32>
    %cst_12 = arith.constant 1.000000e+00 : f32
    %34 = vector.broadcast %cst_12 : f32 to vector<1x1xf32>
    %35 = arith.subf %34, %33 : vector<1x1xf32>
    %36 = vector.shape_cast %35 : vector<1x1xf32> to vector<1x1xf32>
    %37 = vector.broadcast %36 : vector<1x1xf32> to vector<1x128xf32>
    %c0_13 = arith.constant 0 : index
    %c0_14 = arith.constant 0 : index
    %38 = vector.load %arg2[%c0_13, %c0_14] : memref<1x128xf32, #tpu.memory_space<vmem>>, vector<1x128xf32>
    tpu.vector_store %arg2[%c0_13, %c0_14], %37 {strides = array<i32>} : memref<1x128xf32, #tpu.memory_space<vmem>>, vector<1x128xf32>,
    return
  }
}

</mosaic_0001>

<bundles_post_ra>
// kernel: tpu_custom_call.1
= control target key start
LH: loop header
LB: loop body
LE: loop exit
PB: predicated region body
PF: predicated region fallthrough
CT: control target
= control target key end

     0   :  { %7 = vsyncpa [#allocation3], 0  ;;  %s213_s0 = inlined_call_operand.hbm [shape: f32[1,8], index: 0, kind: input, shape index: {}]   ;;  %s214_s1 = inlined_call_operand.hbm [shape: f32[1,8], index: 1, kind: input, shape index: {}]   ;;  %s215_s2 = inlined_call_operand.hbm [shape: f32[1,128], index: 2, kind: output, shape index: {}]  }
   0x1   :  { %8 = vsyncpa [#allocation6], 0 }
   0x2   :  { %9 = vsyncpa [#allocation4], 0  ;;  %s15_s11 = sshll.u32 %s213_s0, 4  ;;  %s186_s12 = smov [#allocation2]   ;;  %s16_s11 = int_to_ptr.hbm [resolvable:$true] %s15_s11 }
   0x3   :  { %s17_s13 = sshll.u32 %s186_s12, 4  ;;  %s26_s16 = sshll.u32 %s214_s1, 4  ;;  %s18_s13 = int_to_ptr.vmem [resolvable:$true] %s17_s13  ;;  %s27_s16 = int_to_ptr.hbm [resolvable:$true] %s26_s16 }
   0x4   :  { %20 = dma.hbm_to_vmem [thread:$0]  %s16_s11, 16, %s18_s13, [#allocation3]  }
   0x5   :  { %s187_s17 = smov [#allocation5]  }
   0x6   :  { %s28_s18 = sshll.u32 %s187_s17, 4  ;;  %s29_s18 = int_to_ptr.vmem [resolvable:$true] %s28_s18 }
   0x7   :  { %31 = dma.hbm_to_vmem [thread:$0]  %s27_s16, 16, %s29_s18, [#allocation6]  }
   0x8   :  { %180 = dma.done.wait [#allocation3], 16  }
   0x9   :  { %181 = vsyncadd [#allocation3], 4294967280 }
   0xa   :  { %182 = dma.done.wait [#allocation6], 16  }
   0xb   :  { %183 = vsyncadd [#allocation6], 4294967280  ;;  %vm42_vm0 = vcmask 57344   ;;  %v40_v0 = vld [vmem:[#allocation2] sm:$0x1]  ;;  %s188_s0 = smov [#allocation7]  }
   0xc   :  { %v41_v1 = vld [vmem:[#allocation5] sm:$0x1]  ;;  %v43_v2 = vsel %vm42_vm0, %v40_v0, 0.0  ;;  %v53_v3 = vmul.f32 %v40_v0, %v40_v0  ;;  %s90_s1 = sshll.u32 %s188_s0, 4  ;;  %s92_s21 = sshll.u32 %s215_s2, 4  ;;  %s91_s1 = int_to_ptr.vmem [resolvable:$true] %s90_s1  ;;  %s93_s21 = int_to_ptr.hbm [resolvable:$true] %s92_s21 }
   0xd   :  { %v49_v4 = vmul.f32 %v41_v1, %v40_v0  ;;  %44 = vadd.xlane.f32.xlu0 %v43_v2  ;;  %v57_v7 = vmul.f32 %v41_v1, %v41_v1  ;;  %v46_v8 = vsel %vm42_vm0, %v41_v1, 0.0 }
   0xe   :  { %v54_v5 = vsel %vm42_vm0, %v53_v3, 0.0 }
   0xf   :  { %v50_v6 = vsel %vm42_vm0, %v49_v4, 0.0  ;;  %55 = vadd.xlane.f32.xlu1 %v54_v5  ;;  %v58_v9 = vsel %vm42_vm0, %v57_v7, 0.0 }
  0x10   :  { %51 = vadd.xlane.f32.xlu2 %v50_v6 }
  0x15   :  { %47 = vadd.xlane.f32.xlu0 %v46_v8 }
  0x17   :  { %59 = vadd.xlane.f32.xlu1 %v58_v9 }
  0x80   :  { %v45_v10 = vpop.xlane.xlu0 %44 }
  0x81   :  { %v61_v12 = vmul.f32 0.125, %v45_v10 }
  0x82   :  { %v56_v11 = vpop.xlane.xlu1 %55 }
  0x83   :  { %v63_v13 = vmul.f32 8.0, %v61_v12  ;;  %v52_v28 = vpop.xlane.xlu2 %51 }
  0x85   :  { %v66_v16 = vmul.f32 %v63_v13, %v61_v12 }
  0x87   :  { %v67_v20 = vsub.f32 %v56_v11, %v66_v16 }
  0x88   :  { %v48_v14 = vpop.xlane.xlu0 %47 }
  0x89   :  { %v62_v15 = vmul.f32 0.125, %v48_v14 }
  0x8a   :  { %v60_v18 = vpop.xlane.xlu1 %59 }
  0x8b   :  { %v68_v17 = vmul.f32 8.0, %v62_v15  ;;  %v64_v27 = vmul.f32 %v63_v13, %v62_v15 }
  0x8d   :  { %v69_v19 = vmul.f32 %v68_v17, %v62_v15  ;;  %v65_v31 = vsub.f32 %v52_v28, %v64_v27 }
  0x8f   :  { %v70_v21 = vsub.f32 %v60_v18, %v69_v19 }
  0x91   :  { %v71_v22 = vmul.f32 %v70_v21, %v67_v20 }
  0x93   :  { %106 = vrsqrt.f32 %v71_v22  ;;  %vm78_vm2 = vweird.f32 %v71_v22 }
  0x99   :  { %v107_v23 = vpop.eup %106 }
  0x9a   :  { %v73_v24 = vmul.f32 %v107_v23, %v71_v22  ;;  %vm79_vm1 = vweird.f32 %v107_v23 }
  0x9b   :  { %vm80_vm3 = vmor %vm78_vm2, %vm79_vm1 }
  0x9c   :  { %v74_v25 = vmul.f32 %v107_v23, %v73_v24 }
  0x9e   :  { %v75_v26 = vmul.f32 0.5, %v74_v25 }
  0xa0   :  { %v76_v29 = vsub.f32 1.5, %v75_v26 }
  0xa2   :  { %v77_v30 = vmul.f32 %v107_v23, %v76_v29 }
  0xa4   :  { %v81_v32 = vsel %vm80_vm3, %v107_v23, %v77_v30 }
  0xa5   :  { %v82_v33 = vmul.f32 %v81_v32, %v65_v31 }
  0xa7   :  { %v83_v34 = vsub.f32 1.0, %v82_v33 }
  0xa9   :  { %84 = vst [vmem:[#allocation7] sm:$0x1] %v83_v34 }
  0xaa   :  { %95 = dma.vmem_to_hbm [thread:$0]  %s91_s1, 16, %s93_s21, [#allocation4]  }
  0xab   :  { %184 = dma.done.wait [#allocation4], 16  }
  0xac   :  { %185 = vsyncadd [#allocation4], 4294967280 }
  0xad   :  { %100 = vsyncpa [#allocation3], 1 }
  0xae   :  { %101 = vsyncpa [#allocation6], 1 }
  0xaf   :  { %102 = vsyncpa [#allocation4], 1 }

</bundles_post_ra>
